<compile_context>
chip_gen: v5e
topology: v5e:2x2
jax: 0.10.0
libtpu: 0.0.40
codegen_flags: <defaults>
</compile_context>

<pallas_src>
import math
import functools

import jax
import jax.numpy as jnp
from jax.experimental import pallas as pl
from jax.experimental.pallas import tpu as pltpu


def _cdiv(a, b):
    return -(-a // b)


def _round_up(a, b):
    return _cdiv(a, b) * b


# ---------------------------------------------------------------------------
# Pallas kernels: fused (packed conv-matmul + bias + LayerNorm)
# ---------------------------------------------------------------------------
def _patch_embed_ln_packed_kernel(p_ref, w_ref, a_ref, bgb_ref, o_ref, *, eps):
    # p_ref   : (tile_rows, pack*K)  bf16  -- `pack` tokens packed per physical row
    # w_ref   : (pack*K, pack*E)     bf16  -- block-diagonal conv weight (resident)
    # a_ref   : (pack*E, pack*E)     bf16  -- block-diagonal group-averaging matrix
    # bgb_ref : (3, pack*E)          f32   -- [conv bias; ln gamma; ln beta], lane-tiled
    # o_ref   : (tile_rows, pack*E)  out_dtype
    y = jnp.dot(p_ref[...], w_ref[...], preferred_element_type=jnp.float32)
    y = y + bgb_ref[0:1, :]                              # conv bias
    rows = y.shape[0]

    # LayerNorm stats: one stacked bf16 MXU matmul for mean(y) and mean(y*y)
    # (independent of the main matmul's result chain beyond `y` itself).
    y16 = y.astype(jnp.bfloat16)
    yy = jnp.concatenate([y16, y16 * y16], axis=0)       # (2*rows, pack*E)
    stats = jnp.dot(yy, a_ref[...], preferred_element_type=jnp.float32)
    s1 = stats[:rows, :]                                 # per-token group mean
    s2 = stats[rows:, :]                                 # per-token group mean of y^2
    var = jnp.maximum(s2 - s1 * s1, 0.0)                 # clamp: bf16 cancellation guard

    y_norm = (y - s1) * jax.lax.rsqrt(var + eps)
    o_ref[...] = (y_norm * bgb_ref[1:2, :] + bgb_ref[2:3, :]).astype(o_ref.dtype)


def _patch_embed_ln_wide_kernel(p_ref, w_ref, bgb_ref, o_ref, *, eps):
    # pack == 1 path (E >= 128): cross-lane reduction (XLU) instead of (E,E) matmuls.
    y = jnp.dot(p_ref[...], w_ref[...], preferred_element_type=jnp.float32)
    y = y + bgb_ref[0:1, :]
    mean = jnp.mean(y, axis=-1, keepdims=True)
    cent = y - mean
    var = jnp.mean(cent * cent, axis=-1, keepdims=True)
    y_norm = cent * jax.lax.rsqrt(var + eps)
    o_ref[...] = (y_norm * bgb_ref[1:2, :] + bgb_ref[2:3, :]).astype(o_ref.dtype)


# ---------------------------------------------------------------------------
# Row tiling: big 16-aligned tiles, even "parallel" step count for v7x megacore
# ---------------------------------------------------------------------------
def _choose_row_tiling(mp_rows, target_rows):
    target_rows = max(16, min(int(target_rows), 2048))   # 2048 cap: v5e VMEM-safe
    n = max(1, _cdiv(mp_rows, target_rows))
    # v7x: both TensorCores get balanced work when the 1-D parallel grid has an even
    # step count (>= 4 preferred) — but only split finer when each tile keeps >= 128
    # packed rows of real work (per-step overhead ~0.35 us).
    if n < 4 and mp_rows >= 4 * 128:
        n = 4
    elif n < 2 and mp_rows >= 2 * 128:
        n = 2
    if n > 1 and n % 2 == 1:
        n += 1
    tile = _round_up(_cdiv(mp_rows, n), 16)              # multiple of 16 (bf16 sublanes)
    n = _cdiv(mp_rows, tile)
    if n > 1 and n % 2 == 1:
        n += 1            # may add one all-padding tile; negligible for a mem-bound kernel
    return tile, n


# ---------------------------------------------------------------------------
# pallas_call wrapper: fused matmul + bias + LayerNorm over packed token rows
# ---------------------------------------------------------------------------
def _pallas_patch_embed(patches2d, w_big, a_mat, bgb, *, pack, embed_dim, eps,
                        out_dtype, target_rows):
    """patches2d: (M, K) bf16. Returns (M, E) = LayerNorm(patches2d @ W + bias)."""
    M, K = patches2d.shape
    E = embed_dim
    Kp, Ep = pack * K, pack * E

    Mp = _cdiv(M, pack)
    tile_rows, n_steps = _choose_row_tiling(Mp, target_rows)
    Mp_pad = tile_rows * n_steps
    M_pad = Mp_pad * pack
    if M_pad != M:
        patches2d = jnp.pad(patches2d, ((0, M_pad - M), (0, 0)))
    packed = patches2d.reshape(Mp_pad, Kp)               # free row-major reinterpretation

    # Explicit VMEM budget (v5e default scoped limit is only 16 MiB).
    in_isz = jnp.dtype(packed.dtype).itemsize
    out_isz = jnp.dtype(out_dtype).itemsize
    est = (2 * tile_rows * Kp * in_isz                   # double-buffered patch stream
           + 2 * tile_rows * Ep * out_isz                # double-buffered output
           + 2 * (Kp * Ep * 2 + Ep * Ep * 2 + 3 * Ep * 4)  # resident operands
           + (6 << 20))                                  # in-kernel temps + headroom
    vmem_limit = int(min(max(est, 16 << 20), 56 << 20))

    row_spec = pl.BlockSpec((tile_rows, Kp), lambda i: (i, 0))    # streamed
    out_spec = pl.BlockSpec((tile_rows, Ep), lambda i: (i, 0))
    # Resident (constant index_map) operands.  NOTE: pipeline_mode=pl.Buffered(1) would
    # single-buffer them (small VMEM saving, mostly relevant on v7x); default buffering
    # kept here for maximum lowering compatibility.
    w_spec = pl.BlockSpec((Kp, Ep), lambda i: (0, 0))
    bgb_spec = pl.BlockSpec((3, Ep), lambda i: (0, 0))

    if pack > 1:
        a_spec = pl.BlockSpec((Ep, Ep), lambda i: (0, 0))
        kernel = functools.partial(_patch_embed_ln_packed_kernel, eps=eps)
        in_specs = [row_spec, w_spec, a_spec, bgb_spec]
        operands = (packed, w_big, a_mat, bgb)
    else:
        kernel = functools.partial(_patch_embed_ln_wide_kernel, eps=eps)
        in_specs = [row_spec, w_spec, bgb_spec]
        operands = (packed, w_big, bgb)

    out = pl.pallas_call(
        kernel,
        out_shape=jax.ShapeDtypeStruct((Mp_pad, Ep), out_dtype),
        grid_spec=pltpu.PrefetchScalarGridSpec(
            num_scalar_prefetch=0,
            grid=(n_steps,),
            in_specs=in_specs,
            out_specs=out_spec,
        ),
        compiler_params=pltpu.CompilerParams(
            dimension_semantics=("parallel",),   # v7x: shard row tiles over both TCs
            vmem_limit_bytes=vmem_limit,
        ),
    )(*operands)

    out = out.reshape(M_pad, E)                          # free row-major reinterpretation
    if M_pad != M:
        out = out[:M]
    return out


# ---------------------------------------------------------------------------
# im2col via strided slices (pure data movement, no gather; bf16 end-to-end)
# ---------------------------------------------------------------------------
# TODO(synk): fuse this patch extraction into the Pallas kernel (pl.ANY + manual DMA of
# padded image row windows) to eliminate the kh*kw/stride^2 (~3x) HBM intermediate.
def _extract_patches_nhwc(x_nhwc, kh, kw, stride, pad):
    """x_nhwc: (N, H, W, C) -> (N, Ho, Wo, kh*kw*C), feature order (r, s, c)."""
    N, H, W, C = x_nhwc.shape
    xp = jnp.pad(x_nhwc, ((0, 0), (pad, pad), (pad, pad), (0, 0)))
    Ho = (H + 2 * pad - kh) // stride + 1
    Wo = (W + 2 * pad - kw) // stride + 1
    pieces = []
    for r in range(kh):
        for s in range(kw):
            pieces.append(jax.lax.slice(
                xp,
                (0, r, s, 0),
                (N, r + (Ho - 1) * stride + 1, s + (Wo - 1) * stride + 1, C),
                (1, stride, stride, 1)))
    patches = jnp.concatenate(pieces, axis=-1)           # (N, Ho, Wo, kh*kw*C)
    return patches, Ho, Wo


# ---------------------------------------------------------------------------
# Jitted end-to-end forward (im2col + fused Pallas matmul/LN in one XLA program)
# ---------------------------------------------------------------------------
def _forward_impl(x, w_big, a_mat, bgb, *, patch, stride, pad, embed_dim, pack,
                  eps, out_dtype, target_rows):
    N, C, H, W = x.shape
    # NCHW -> NHWC; stream the image / patches in bf16 (halves HBM bytes; f32 accumulate).
    x_nhwc = jnp.transpose(x, (0, 2, 3, 1)).astype(jnp.bfloat16)
    patches, Ho, Wo = _extract_patches_nhwc(x_nhwc, patch, patch, stride, pad)
    K = patch * patch * C
    patches2d = patches.reshape(N * Ho * Wo, K)
    y = _pallas_patch_embed(patches2d, w_big, a_mat, bgb, pack=pack,
                            embed_dim=embed_dim, eps=eps, out_dtype=out_dtype,
                            target_rows=target_rows)
    return y.reshape(N, Ho * Wo, embed_dim)


# ---------------------------------------------------------------------------
# Module wrapper
# ---------------------------------------------------------------------------
class OverlapPatchEmbedPallas:
    def __init__(self, img_size=16, patch_size=7, stride=4, in_chans=3,
                 embed_dim=32, key=None, conv_weight=None, conv_bias=None,
                 ln_gamma=None, ln_beta=None, out_dtype=jnp.float32,
                 target_rows=1024):
        self.img_size = (img_size, img_size)
        self.patch_size = int(patch_size)
        self.stride = int(stride)
        self.in_chans = int(in_chans)
        self.embed_dim = int(embed_dim)
        self.pad = self.patch_size // 2
        self.ln_eps = 1e-5
        self.out_dtype = out_dtype

        if key is None:
            key = jax.random.PRNGKey(0)

        # Init matching the PyTorch module:
        #   Conv2d weight ~ N(0, sqrt(2/fan_out)), bias = 0; LayerNorm gamma=1, beta=0.
        fan_out = self.patch_size * self.patch_size * self.embed_dim
        std = math.sqrt(2.0 / fan_out)
        self.conv_weight = (conv_weight if conv_weight is not None else
                            std * jax.random.normal(
                                key, (self.embed_dim, self.in_chans,
                                      self.patch_size, self.patch_size), jnp.float32))
        self.conv_bias = (conv_bias if conv_bias is not None
                          else jnp.zeros((self.embed_dim,), jnp.float32))
        self.ln_gamma = (ln_gamma if ln_gamma is not None
                         else jnp.ones((self.embed_dim,), jnp.float32))
        self.ln_beta = (ln_beta if ln_beta is not None
                        else jnp.zeros((self.embed_dim,), jnp.float32))

        # ---- hoisted (once per module, not per call) weight preparation ----
        E = self.embed_dim
        K = self.patch_size * self.patch_size * self.in_chans
        self.pack = 128 // E if (E < 128 and 128 % E == 0) else 1
        # (E, C, kh, kw) -> (kh, kw, C, E) -> (K, E), matching the (r, s, c) patch order.
        w_mat = jnp.transpose(self.conv_weight, (2, 3, 1, 0)).reshape(K, E)
        if self.pack > 1:
            eye = jnp.eye(self.pack, dtype=jnp.float32)
            # Block-diagonal conv weight: `pack` tokens share one physical row.
            self._w_big = jnp.kron(eye, w_mat.astype(jnp.float32)).astype(jnp.bfloat16)
            # Block-diagonal group-averaging matrix; bf16 is exact since E | 128
            # implies E is a power of two, so 1/E is exactly representable.
            self._a_mat = jnp.kron(
                eye, jnp.full((E, E), 1.0 / E, jnp.float32)).astype(jnp.bfloat16)
        else:
            self._w_big = w_mat.astype(jnp.bfloat16)
            self._a_mat = None
        self._bgb = jnp.stack([jnp.tile(self.conv_bias, self.pack),
                               jnp.tile(self.ln_gamma, self.pack),
                               jnp.tile(self.ln_beta, self.pack)]).astype(jnp.float32)

        self._forward = jax.jit(functools.partial(
            _forward_impl, patch=self.patch_size, stride=self.stride, pad=self.pad,
            embed_dim=E, pack=self.pack, eps=self.ln_eps, out_dtype=out_dtype,
            target_rows=target_rows))

    def __call__(self, x):
        """x: (N, C, H, W) float32 (NCHW, like PyTorch). Returns (y, Ho, Wo)."""
        N, C, H, W = x.shape
        assert C == self.in_chans
        Ho = (H + 2 * self.pad - self.patch_size) // self.stride + 1
        Wo = (W + 2 * self.pad - self.patch_size) // self.stride + 1
        y = self._forward(x, self._w_big, self._a_mat, self._bgb)
        return y, Ho, Wo


# ---------------------------------------------------------------------------
# Pure-JAX (full f32) reference for sanity checking
# ---------------------------------------------------------------------------
def _reference(module, x):
    y = jax.lax.conv_general_dilated(
        x, module.conv_weight,
        window_strides=(module.stride, module.stride),
        padding=[(module.pad, module.pad), (module.pad, module.pad)],
        dimension_numbers=("NCHW", "OIHW", "NCHW"),
    ) + module.conv_bias[None, :, None, None]
    N, E, Ho, Wo = y.shape
    y = jnp.transpose(y.reshape(N, E, Ho * Wo), (0, 2, 1))
    mean = jnp.mean(y, axis=-1, keepdims=True)
    var = jnp.mean((y - mean) ** 2, axis=-1, keepdims=True)
    y = (y - mean) * jax.lax.rsqrt(var + module.ln_eps)
    y = y * module.ln_gamma + module.ln_beta
    return y, Ho, Wo


if __name__ == "__main__":
    key = jax.random.PRNGKey(0)
    k_x, k_w, k_b, k_g, k_bt = jax.random.split(key, 5)

    # Small shapes: batch=2, in_chans=4, img=16x16, patch=7, stride=4, embed_dim=32.
    x = jax.random.normal(k_x, (2, 4, 16, 16), jnp.float32)

    # Non-trivial bias / LayerNorm params (passed at construction so the hoisted
    # weight preparation sees them) to exercise every term in the fused kernel.
    module = OverlapPatchEmbedPallas(
        img_size=16, patch_size=7, stride=4, in_chans=4, embed_dim=32, key=k_w,
        conv_bias=0.1 * jax.random.normal(k_b, (32,), jnp.float32),
        ln_gamma=1.0 + 0.1 * jax.random.normal(k_g, (32,), jnp.float32),
        ln_beta=0.1 * jax.random.normal(k_bt, (32,), jnp.float32),
    )

    out, H, W = module(x)
    out = jax.block_until_ready(out)

    ref, Hr, Wr = _reference(module, x)
    assert (H, W) == (Hr, Wr)
    assert out.shape == ref.shape == (2, H * W, 32)
    # bf16 streamed operands and bf16 LN-stat matmuls (f32 MXU accumulate, f32 LN math)
    # vs. a full-f32 reference -> loose 5e-2 tolerance (documented per review).
    assert bool(jnp.allclose(out, ref, atol=5e-2, rtol=5e-2))

    print("KERNEL_OK")
</pallas_src>

<mosaic_0001>
module attributes {stable_mosaic.version = 11 : i64} {
  func.func @_patch_embed_ln_packed_kernel(%arg0: i32, %arg1: memref<16x784xbf16, #tpu.memory_space<vmem>>, %arg2: memref<784x128xbf16, #tpu.memory_space<vmem>>, %arg3: memref<128x128xbf16, #tpu.memory_space<vmem>>, %arg4: memref<3x128xf32, #tpu.memory_space<vmem>>, %arg5: memref<16x128xf32, #tpu.memory_space<vmem>>) attributes {dimension_semantics = [#tpu.dimension_semantics<parallel>], iteration_bounds = array<i64: 1>, scalar_prefetch = 0 : i64, scratch_operands = 0 : i64, tpu.core_type = #tpu.core_type<tc>, window_params = [{transform_indices = @transform_0, window_bounds = array<i64: 16, 784>}, {pipeline_mode = #tpu.pipeline_mode<synchronous>, transform_indices = @transform_1, window_bounds = array<i64: 784, 128>}, {pipeline_mode = #tpu.pipeline_mode<synchronous>, transform_indices = @transform_2, window_bounds = array<i64: 128, 128>}, {pipeline_mode = #tpu.pipeline_mode<synchronous>, transform_indices = @transform_3, window_bounds = array<i64: 3, 128>}, {transform_indices = @transform_4, window_bounds = array<i64: 16, 128>}]} {
    %c0 = arith.constant 0 : index
    %c0_0 = arith.constant 0 : index
    %0 = vector.load %arg1[%c0, %c0_0] : memref<16x784xbf16, #tpu.memory_space<vmem>>, vector<16x784xbf16>
    %c0_1 = arith.constant 0 : index
    %c0_2 = arith.constant 0 : index
    %1 = vector.load %arg2[%c0_1, %c0_2] : memref<784x128xbf16, #tpu.memory_space<vmem>>, vector<784x128xbf16>
    %cst = arith.constant dense<0.000000e+00> : vector<16x128xf32>
    %2 = tpu.matmul %0, %1, %cst {dimension_numbers = #tpu.dot_dimension_numbers<[1], [0], [0], [1], [0, 0, 1, 1], [], []>} : vector<16x784xbf16>, vector<784x128xbf16>, vector<16x128xf32> -> vector<16x128xf32>
    %c0_3 = arith.constant 0 : index
    %c0_4 = arith.constant 0 : index
    %3 = vector.load %arg4[%c0_3, %c0_4] : memref<3x128xf32, #tpu.memory_space<vmem>>, vector<1x128xf32>
    %4 = vector.broadcast %3 : vector<1x128xf32> to vector<16x128xf32>
    %5 = arith.addf %2, %4 : vector<16x128xf32>
    %6 = arith.truncf %5 : vector<16x128xf32> to vector<16x128xbf16>
    %7 = arith.mulf %6, %6 : vector<16x128xbf16>
    %8 = tpu.concatenate %6, %7 in 0 : vector<16x128xbf16>, vector<16x128xbf16> -> vector<32x128xbf16>
    %c0_5 = arith.constant 0 : index
    %c0_6 = arith.constant 0 : index
    %9 = vector.load %arg3[%c0_5, %c0_6] : memref<128x128xbf16, #tpu.memory_space<vmem>>, vector<128x128xbf16>
    %cst_7 = arith.constant dense<0.000000e+00> : vector<32x128xf32>
    %10 = tpu.matmul %8, %9, %cst_7 {dimension_numbers = #tpu.dot_dimension_numbers<[1], [0], [0], [1], [0, 0, 1, 1], [], []>} : vector<32x128xbf16>, vector<128x128xbf16>, vector<32x128xf32> -> vector<32x128xf32>
    %11 = vector.extract_strided_slice %10 {offsets = [0, 0], sizes = [16, 128], strides = [1, 1]} : vector<32x128xf32> to vector<16x128xf32>
    %12 = vector.extract_strided_slice %10 {offsets = [16, 0], sizes = [16, 128], strides = [1, 1]} : vector<32x128xf32> to vector<16x128xf32>
    %13 = arith.mulf %11, %11 : vector<16x128xf32>
    %14 = arith.subf %12, %13 : vector<16x128xf32>
    %cst_8 = arith.constant 0.000000e+00 : f32
    %15 = vector.broadcast %cst_8 : f32 to vector<16x128xf32>
    %16 = arith.maximumf %14, %15 : vector<16x128xf32>
    %17 = arith.subf %5, %11 : vector<16x128xf32>
    %cst_9 = arith.constant 9.99999974E-6 : f32
    %18 = vector.broadcast %cst_9 : f32 to vector<16x128xf32>
    %19 = arith.addf %16, %18 : vector<16x128xf32>
    %20 = math.rsqrt %19 : vector<16x128xf32>
    %21 = arith.mulf %17, %20 : vector<16x128xf32>
    %c1 = arith.constant 1 : index
    %c0_10 = arith.constant 0 : index
    %22 = vector.load %arg4[%c1, %c0_10] : memref<3x128xf32, #tpu.memory_space<vmem>>, vector<1x128xf32>
    %23 = vector.broadcast %22 : vector<1x128xf32> to vector<16x128xf32>
    %24 = arith.mulf %21, %23 : vector<16x128xf32>
    %c2 = arith.constant 2 : index
    %c0_11 = arith.constant 0 : index
    %25 = vector.load %arg4[%c2, %c0_11] : memref<3x128xf32, #tpu.memory_space<vmem>>, vector<1x128xf32>
    %26 = vector.broadcast %25 : vector<1x128xf32> to vector<16x128xf32>
    %27 = arith.addf %24, %26 : vector<16x128xf32>
    %c0_12 = arith.constant 0 : index
    %c0_13 = arith.constant 0 : index
    %28 = vector.load %arg5[%c0_12, %c0_13] : memref<16x128xf32, #tpu.memory_space<vmem>>, vector<16x128xf32>
    tpu.vector_store %arg5[%c0_12, %c0_13], %27 {strides = array<i32>} : memref<16x128xf32, #tpu.memory_space<vmem>>, vector<16x128xf32>,
    return
  }
  func.func @transform_0(%arg0: i32) -> (i32, i32) {
    %c0_i32 = arith.constant 0 : i32
    %c0_i32_0 = arith.constant 0 : i32
    return %arg0, %c0_i32 : i32, i32
  }
  func.func @transform_1(%arg0: i32) -> (i32, i32) {
    %c0_i32 = arith.constant 0 : i32
    %c0_i32_0 = arith.constant 0 : i32
    %c0_i32_1 = arith.constant 0 : i32
    return %c0_i32, %c0_i32_0 : i32, i32
  }
  func.func @transform_2(%arg0: i32) -> (i32, i32) {
    %c0_i32 = arith.constant 0 : i32
    %c0_i32_0 = arith.constant 0 : i32
    %c0_i32_1 = arith.constant 0 : i32
    return %c0_i32, %c0_i32_0 : i32, i32
  }
  func.func @transform_3(%arg0: i32) -> (i32, i32) {
    %c0_i32 = arith.constant 0 : i32
    %c0_i32_0 = arith.constant 0 : i32
    %c0_i32_1 = arith.constant 0 : i32
    return %c0_i32, %c0_i32_0 : i32, i32
  }
  func.func @transform_4(%arg0: i32) -> (i32, i32) {
    %c0_i32 = arith.constant 0 : i32
    %c0_i32_0 = arith.constant 0 : i32
    return %arg0, %c0_i32 : i32, i32
  }
}

</mosaic_0001>

<bundles_post_ra>
// kernel: _forward_impl.1
= control target key start
LH: loop header
LB: loop body
LE: loop exit
PB: predicated region body
PF: predicated region fallthrough
CT: control target
= control target key end

     0   :  { %vm455_vm0 = vcmask 130048   ;;  %s1287_s1 = inlined_call_operand.vmem [shape: bf16[784,128], index: 1, kind: input, shape index: {}]   ;;  %s1288_s3 = inlined_call_operand.vmem [shape: f32[3,128], index: 3, kind: input, shape index: {}]   ;;  %s1289_s0 = inlined_call_operand.vmem [shape: bf16[16,784], index: 0, kind: input, shape index: {}]   ;;  %s1290_s2 = inlined_call_operand.vmem [shape: bf16[128,128], index: 2, kind: input, shape index: {}]   ;;  %s1291_s4 = inlined_call_operand.vmem [shape: f32[16,128], index: 4, kind: output, shape index: {}]  }
   0x1   :  { %v977_v0 = vld [vmem:[%s1287_s1 + $0x38] sm:$0xff]  ;;  %v976_v4 = vld [vmem:[%s1287_s1 + $0x30] sm:$0xff]  ;;  %v975_v8 = vld [vmem:[%s1287_s1 + $0x28] sm:$0xff] }
   0x2   :  { %v985_v1 = vld [vmem:[%s1287_s1 + $0x78] sm:$0xff]  ;;  %459 = vmatpush.bf16.msra.mxu0 %v977_v0  ;;  %v984_v5 = vld [vmem:[%s1287_s1 + $0x70] sm:$0xff]  ;;  %v983_v9 = vld [vmem:[%s1287_s1 + $0x68] sm:$0xff] }
   0x3   :  { %v993_v2 = vld [vmem:[%s1287_s1 + $0xb8] sm:$0xff]  ;;  %473 = vmatpush.bf16.msra.mxu1 %v985_v1  ;;  %v992_v6 = vld [vmem:[%s1287_s1 + $0xb0] sm:$0xff]  ;;  %v991_v10 = vld [vmem:[%s1287_s1 + $0xa8] sm:$0xff] }
   0x4   :  { %v1001_v3 = vld [vmem:[%s1287_s1 + $0xf8] sm:$0xff]  ;;  %487 = vmatpush.bf16.msra.mxu2 %v993_v2  ;;  %v1000_v7 = vld [vmem:[%s1287_s1 + $0xf0] sm:$0xff]  ;;  %v999_v11 = vld [vmem:[%s1287_s1 + $0xe8] sm:$0xff] }
   0x5   :  { %501 = vmatpush.bf16.msra.mxu3 %v1001_v3  ;;  %v974_v12 = vld [vmem:[%s1287_s1 + $0x20] sm:$0xff]  ;;  %v973_v16 = vld [vmem:[%s1287_s1 + $0x18] sm:$0xff]  ;;  %v972_v20 = vld [vmem:[%s1287_s1 + $0x10] sm:$0xff] }
   0x6   :  { %460 = vmatpush.bf16.msra.mxu0 %v976_v4  ;;  %v982_v13 = vld [vmem:[%s1287_s1 + $0x60] sm:$0xff]  ;;  %v981_v17 = vld [vmem:[%s1287_s1 + $0x58] sm:$0xff]  ;;  %v980_v21 = vld [vmem:[%s1287_s1 + $0x50] sm:$0xff] }
   0x7   :  { %474 = vmatpush.bf16.msra.mxu1 %v984_v5  ;;  %v990_v14 = vld [vmem:[%s1287_s1 + $0xa0] sm:$0xff]  ;;  %v989_v18 = vld [vmem:[%s1287_s1 + $0x98] sm:$0xff]  ;;  %v988_v22 = vld [vmem:[%s1287_s1 + $0x90] sm:$0xff] }
   0x8   :  { %488 = vmatpush.bf16.msra.mxu2 %v992_v6  ;;  %v998_v15 = vld [vmem:[%s1287_s1 + $0xe0] sm:$0xff]  ;;  %v997_v19 = vld [vmem:[%s1287_s1 + $0xd8] sm:$0xff]  ;;  %v996_v23 = vld [vmem:[%s1287_s1 + $0xd0] sm:$0xff] }
   0x9   :  { %502 = vmatpush.bf16.msra.mxu3 %v1000_v7  ;;  %v971_v24 = vld [vmem:[%s1287_s1 + $0x8] sm:$0xff]  ;;  %v970_v28 = vld [vmem:[%s1287_s1] sm:$0xff]  ;;  %v966_v31 = vld [vmem:[%s1289_s0 + $0x18] sm:$0xf0] }
   0xa   :  { %461 = vmatpush.bf16.msra.mxu0 %v975_v8  ;;  %v979_v25 = vld [vmem:[%s1287_s1 + $0x48] sm:$0xff]  ;;  %v978_v29 = vld [vmem:[%s1287_s1 + $0x40] sm:$0xff]  ;;  %v1009_v34 = vld [vmem:[%s1287_s1 + $0x138] sm:$0xff] }
   0xb   :  { %475 = vmatpush.bf16.msra.mxu1 %v983_v9  ;;  %v987_v26 = vld [vmem:[%s1287_s1 + $0x88] sm:$0xff]  ;;  %v708_v30 = vld [vmem:[%s1289_s0] sm:$0xf]  ;;  %v963_v32 = vld [vmem:[%s1289_s0 + $0x4] sm:$0xf] }
   0xc   :  { %489 = vmatpush.bf16.msra.mxu2 %v991_v10  ;;  %v995_v27 = vld [vmem:[%s1287_s1 + $0xc8] sm:$0xff]  ;;  %v710_v33 = vld [vmem:[%s1289_s0 + $0x1c] sm:$0xf0]  ;;  %v1017_v35 = vld [vmem:[%s1287_s1 + $0x178] sm:$0xff]  ;;  %v709_v40 = vor.u32 %v966_v31, %v708_v30 }
   0xd   :  { %503 = vmatpush.bf16.msra.mxu3 %v999_v11  ;;  %v986_v36 = vld [vmem:[%s1287_s1 + $0x80] sm:$0xff]  ;;  %v716_v38 = vld [vmem:[%s1289_s0 + $0x8] sm:$0xf]  ;;  %v964_v41 = vld [vmem:[%s1289_s0 + $0xc] sm:$0xf]  ;;  %v713_v43 = vor.u32 %v963_v32, %v710_v33 }
   0xe   :  { %462 = vmatpush.bf16.msra.mxu0 %v974_v12  ;;  %v994_v37 = vld [vmem:[%s1287_s1 + $0xc0] sm:$0xff]  ;;  %v718_v42 = vld [vmem:[%s1289_s0 + $0x24] sm:$0xf0]  ;;  %v1008_v45 = vld [vmem:[%s1287_s1 + $0x130] sm:$0xff] }
   0xf   :  { %476 = vmatpush.bf16.msra.mxu1 %v982_v13  ;;  %v967_v39 = vld [vmem:[%s1289_s0 + $0x20] sm:$0xf0]  ;;  %v1016_v46 = vld [vmem:[%s1287_s1 + $0x170] sm:$0xff]  ;;  %v721_v48 = vor.u32 %v964_v41, %v718_v42  ;;  %v1007_v49 = vld [vmem:[%s1287_s1 + $0x128] sm:$0xff] }
  0x10   :  { %490 = vmatpush.bf16.msra.mxu2 %v990_v14  ;;  %v1018_v44 = vld [vmem:[%s1287_s1 + $0x180] sm:$0xff]  ;;  %v717_v47 = vor.u32 %v967_v39, %v716_v38  ;;  %v1015_v50 = vld [vmem:[%s1287_s1 + $0x168] sm:$0xff]  ;;  %v1005_v53 = vld [vmem:[%s1287_s1 + $0x118] sm:$0xff] }
  0x11   :  { %504 = vmatpush.bf16.msra.mxu3 %v998_v15  ;;  %v1006_v51 = vld [vmem:[%s1287_s1 + $0x120] sm:$0xff]  ;;  %v1013_v54 = vld [vmem:[%s1287_s1 + $0x158] sm:$0xff]  ;;  %v969_v56 = vld [vmem:[%s1289_s0 + $0x30] sm:$0xf0] }
  0x12   :  { %463 = vmatpush.bf16.msra.mxu0 %v973_v16  ;;  %v1014_v52 = vld [vmem:[%s1287_s1 + $0x160] sm:$0xff]  ;;  %v732_v55 = vld [vmem:[%s1289_s0 + $0x18] sm:$0xf]  ;;  %v1004_v57 = vld [vmem:[%s1287_s1 + $0x110] sm:$0xff] }
  0x13   :  { %477 = vmatpush.bf16.msra.mxu1 %v981_v17  ;;  %v1012_v58 = vld [vmem:[%s1287_s1 + $0x150] sm:$0xff]  ;;  %v733_v59 = vor.u32 %v969_v56, %v732_v55  ;;  %v1003_v60 = vld [vmem:[%s1287_s1 + $0x108] sm:$0xff]  ;;  %v1002_v62 = vld [vmem:[%s1287_s1 + $0x100] sm:$0xff] }
  0x14   :  { %491 = vmatpush.bf16.msra.mxu2 %v989_v18  ;;  %v1011_v61 = vld [vmem:[%s1287_s1 + $0x148] sm:$0xff]  ;;  %v1010_v63 = vld [vmem:[%s1287_s1 + $0x140] sm:$0xff]  ;;  %v724_v0 = vld [vmem:[%s1289_s0 + $0x10] sm:$0xf] }
  0x15   :  { %505 = vmatpush.bf16.msra.mxu3 %v997_v19  ;;  %v968_v1 = vld [vmem:[%s1289_s0 + $0x28] sm:$0xf0]  ;;  %v965_v2 = vld [vmem:[%s1289_s0 + $0x14] sm:$0xf]  ;;  %v726_v3 = vld [vmem:[%s1289_s0 + $0x2c] sm:$0xf0] }
  0x16   :  { %464 = vmatpush.bf16.msra.mxu0 %v972_v20  ;;  %v725_v4 = vor.u32 %v968_v1, %v724_v0  ;;  %v729_v5 = vor.u32 %v965_v2, %v726_v3  ;;  %v1026_v6 = vld [vmem:[%s1290_s2 + $0x38] sm:$0xff]  ;;  %v1025_v7 = vld [vmem:[%s1290_s2 + $0x30] sm:$0xff]  ;;  %v1024_v8 = vld [vmem:[%s1290_s2 + $0x28] sm:$0xff] }
  0x17   :  { %478 = vmatpush.bf16.msra.mxu1 %v980_v21  ;;  %v1023_v9 = vld [vmem:[%s1290_s2 + $0x20] sm:$0xff]  ;;  %v1022_v10 = vld [vmem:[%s1290_s2 + $0x18] sm:$0xff]  ;;  %v1021_v11 = vld [vmem:[%s1290_s2 + $0x10] sm:$0xff] }
  0x18   :  { %492 = vmatpush.bf16.msra.mxu2 %v988_v22  ;;  %v1020_v12 = vld [vmem:[%s1290_s2 + $0x8] sm:$0xff]  ;;  %v1027_v16 = vld [vmem:[%s1288_s3] ss:$0 sm:$0xff] }
  0x19   :  { %506 = vmatpush.bf16.msra.mxu3 %v996_v23  ;;  %v1019_v17 = vld [vmem:[%s1290_s2] sm:$0xff] }
  0x1a   :  { %465 = vmatpush.bf16.msra.mxu0 %v971_v24 }
  0x1b   :  { %479 = vmatpush.bf16.msra.mxu1 %v979_v25 }
  0x1c   :  { %493 = vmatpush.bf16.msra.mxu2 %v987_v26 }
  0x1d   :  { %507 = vmatpush.bf16.msra.mxu3 %v995_v27 }
  0x1e   :  { %466 = vmatpush.bf16.msra.mxu0 %v970_v28 }
  0x1f   :  { %480 = vmatpush.bf16.msra.mxu1 %v978_v29 }
  0x20   :  { %494 = vmatpush.bf16.msra.mxu2 %v986_v36 }
  0x21   :  { %508 = vmatpush.bf16.msra.mxu3 %v994_v37  ;;  %467 = vmatmul.bf16.vlgmr.msra.gmra.mxu0 %v709_v40 }
  0x22   :  { %515 = vmatpush.bf16.msrb.mxu0 %v1009_v34  ;;  %481 = vmatmul.bf16.vlgmr.msra.gmra.mxu1 %v713_v43 }
  0x23   :  { %529 = vmatpush.bf16.msrb.mxu1 %v1017_v35  ;;  %495 = vmatmul.bf16.vlgmr.msra.gmra.mxu2 %v717_v47 }
  0x24   :  { %550 = vmatpush.bf16.msrb.mxu2 %v1018_v44  ;;  %509 = vmatmul.bf16.vlgmr.msra.gmra.mxu3 %v721_v48 }
  0x25   :  { %641 = vmatpush.bf16.msrb.mxu3 %v1026_v6 }
  0x26   :  { %516 = vmatpush.bf16.msrb.mxu0 %v1008_v45 }
  0x27   :  { %530 = vmatpush.bf16.msrb.mxu1 %v1016_v46 }
  0x29   :  { %642 = vmatpush.bf16.msrb.mxu3 %v1025_v7 }
  0x2a   :  { %517 = vmatpush.bf16.msrb.mxu0 %v1007_v49 }
  0x2b   :  { %531 = vmatpush.bf16.msrb.mxu1 %v1015_v50 }
  0x2d   :  { %643 = vmatpush.bf16.msrb.mxu3 %v1024_v8 }
  0x2e   :  { %518 = vmatpush.bf16.msrb.mxu0 %v1006_v51 }
  0x2f   :  { %532 = vmatpush.bf16.msrb.mxu1 %v1014_v52 }
  0x31   :  { %644 = vmatpush.bf16.msrb.mxu3 %v1023_v9 }
  0x32   :  { %519 = vmatpush.bf16.msrb.mxu0 %v1005_v53 }
  0x33   :  { %533 = vmatpush.bf16.msrb.mxu1 %v1013_v54  ;;  %930 = vmatmul.msk.bf16.vlgmr.msrb.gmra.mxu2 %vm455_vm0, %v733_v59 }
  0x35   :  { %645 = vmatpush.bf16.msrb.mxu3 %v1022_v10 }
  0x36   :  { %520 = vmatpush.bf16.msrb.mxu0 %v1004_v57 }
  0x37   :  { %534 = vmatpush.bf16.msrb.mxu1 %v1012_v58 }
  0x39   :  { %646 = vmatpush.bf16.msrb.mxu3 %v1021_v11 }
  0x3a   :  { %521 = vmatpush.bf16.msrb.mxu0 %v1003_v60 }
  0x3b   :  { %535 = vmatpush.bf16.msrb.mxu1 %v1011_v61 }
  0x3d   :  { %647 = vmatpush.bf16.msrb.mxu3 %v1020_v12 }
  0x3e   :  { %522 = vmatpush.bf16.msrb.mxu0 %v1002_v62 }
  0x3f   :  { %536 = vmatpush.bf16.msrb.mxu1 %v1010_v63 }
  0x41   :  { %523 = vmatmul.bf16.vlgmr.msrb.gmra.mxu0 %v725_v4  ;;  %648 = vmatpush.bf16.msrb.mxu3 %v1019_v17  ;;  %v1029_v17 = vld [vmem:[%s1288_s3 + $0x2] ss:$0 sm:$0xff] }
  0x42   :  { %537 = vmatmul.bf16.vlgmr.msrb.gmra.mxu1 %v729_v5 }
  0x9e   :  { %v468_v13 = vpop.f32.mrf.mxu0 }
  0x9f   :  { %v482_v14 = vpop.f32.mrf.mxu1  ;;  %v469_v18 = vadd.f32 %v1027_v16, %v468_v13  ;;  %v1028_v13 = vld [vmem:[%s1288_s3 + $0x1] ss:$0 sm:$0xff] }
  0xa1   :  { %v483_v19 = vadd.f32 %v482_v14, %v469_v18 }
  0xa6   :  { %v496_v15 = vpop.f32.mrf.mxu2  ;;  %v470_v20 = vpop.f32.mrf.mxu0 }
  0xa7   :  { %v484_v21 = vpop.f32.mrf.mxu1  ;;  %v510_v23 = vpop.f32.mrf.mxu3  ;;  %v497_v24 = vadd.f32 %v496_v15, %v483_v19  ;;  %v471_v25 = vadd.f32 %v1027_v16, %v470_v20 }
  0xa9   :  { %v511_v26 = vadd.f32 %v510_v23, %v497_v24  ;;  %v485_v27 = vadd.f32 %v484_v21, %v471_v25 }
  0xae   :  { %v498_v22 = vpop.f32.mrf.mxu2 }
  0xaf   :  { %v499_v32 = vadd.f32 %v498_v22, %v485_v27  ;;  %v512_v33 = vpop.f32.mrf.mxu3 }
  0xb1   :  { %v513_v35 = vadd.f32 %v512_v33, %v499_v32 }
  0xb6   :  { %v552_v31 = vpop.f32.mrf.mxu2 }
  0xbe   :  { %v524_v28 = vpop.f32.mrf.mxu0  ;;  %v554_v41 = vpop.f32.mrf.mxu2 }
  0xbf   :  { %v538_v29 = vpop.f32.mrf.mxu1  ;;  %v525_v30 = vadd.f32 %v524_v28, %v511_v26 }
  0xc1   :  { %v539_v34 = vadd.f32 %v538_v29, %v525_v30 }
  0xc3   :  { %v553_v37 = vadd.f32 %v552_v31, %v539_v34 }
  0xc5   :  { %v557_v42 = vpack.c.bf16 %v553_v37, %v553_v37 }
  0xc6   :  { %v526_v36 = vpop.f32.mrf.mxu0 }
  0xc7   :  { %v527_v38 = vadd.f32 %v526_v36, %v513_v35  ;;  %v540_v39 = vpop.f32.mrf.mxu1  ;;  %v567_v45 = vunpack.c.l.b16 %v557_v42  ;;  %v559_v49 = vunpack.c.l.bf16 %v557_v42 }
  0xc9   :  { %v541_v40 = vadd.f32 %v540_v39, %v527_v38  ;;  %v561_v51 = vmul.f32 %v559_v49, %v559_v49 }
  0xcb   :  { %v555_v43 = vadd.f32 %v554_v41, %v541_v40  ;;  %v563_v53 = vpack.c.bf16 %v561_v51, %v561_v51 }
  0xcd   :  { %v558_v44 = vpack.c.bf16 %v555_v43, %v555_v43  ;;  %v573_v55 = vunpack.c.l.b16 %v563_v53 }
  0xcf   :  { %v568_v46 = vunpack.c.l.b16 %v558_v44  ;;  %v560_v48 = vunpack.c.l.bf16 %v558_v44 }
  0xd1   :  { %v569_v47 = vpack.c.b16 %v568_v46, %v567_v45  ;;  %v562_v50 = vmul.f32 %v560_v48, %v560_v48 }
  0xd3   :  { %649 = vmatmul.bf16.vlgmr.msrb.gmra.mxu3 %v569_v47  ;;  %v564_v52 = vpack.c.bf16 %v562_v50, %v562_v50 }
  0xd5   :  { %v574_v54 = vunpack.c.l.b16 %v564_v52 }
  0xd7   :  { %v575_v56 = vpack.c.b16 %v574_v54, %v573_v55 }
  0xe3   :  { %654 = vmatmul.bf16.gmra.mxu3 %v575_v56 }
 0x156   :  { %v650_v57 = vpop.f32.mrf.mxu3 }
 0x157   :  { %v660_v59 = vmul.f32 %v650_v57, %v650_v57  ;;  %v666_v14 = vsub.f32 %v553_v37, %v650_v57 }
 0x15e   :  { %v652_v58 = vpop.f32.mrf.mxu3 }
 0x15f   :  { %v661_v0 = vmul.f32 %v652_v58, %v652_v58  ;;  %v667_v24 = vsub.f32 %v555_v43, %v652_v58 }
 0x166   :  { %v655_v60 = vpop.f32.mrf.mxu3 }
 0x167   :  { %v662_v61 = vsub.f32 %v655_v60, %v660_v59 }
 0x169   :  { %v664_v62 = vmax.f32 %v662_v61, 0.0 }
 0x16b   :  { %v668_v63 = vadd.f32 1e-05, %v664_v62 }
 0x16d   :  { %1030 = vrsqrt.f32 %v668_v63  ;;  %vm676_vm2 = vweird.f32 %v668_v63 }
 0x16e   :  { %v657_v1 = vpop.f32.mrf.mxu3 }
 0x16f   :  { %v663_v2 = vsub.f32 %v657_v1, %v661_v0 }
 0x171   :  { %v665_v3 = vmax.f32 %v663_v2, 0.0 }
 0x173   :  { %v1031_v4 = vpop.eup %1030  ;;  %v669_v5 = vadd.f32 1e-05, %v665_v3 }
 0x174   :  { %v671_v6 = vmul.f32 %v1031_v4, %v668_v63  ;;  %vm677_vm1 = vweird.f32 %v1031_v4 }
 0x175   :  { %1032 = vrsqrt.f32 %v669_v5  ;;  %vm678_vm3 = vmor %vm676_vm2, %vm677_vm1  ;;  %vm686_vm5 = vweird.f32 %v669_v5 }
 0x176   :  { %v672_v7 = vmul.f32 %v1031_v4, %v671_v6 }
 0x178   :  { %v673_v8 = vmul.f32 0.5, %v672_v7 }
 0x17a   :  { %v674_v9 = vsub.f32 1.5, %v673_v8 }
 0x17b   :  { %v1033_v10 = vpop.eup %1032 }
 0x17c   :  { %v675_v11 = vmul.f32 %v1031_v4, %v674_v9  ;;  %v681_v12 = vmul.f32 %v1033_v10, %v669_v5  ;;  %vm687_vm4 = vweird.f32 %v1033_v10 }
 0x17d   :  { %vm688_vm6 = vmor %vm686_vm5, %vm687_vm4 }
 0x17e   :  { %v679_v15 = vsel %vm678_vm3, %v1031_v4, %v675_v11  ;;  %v682_v16 = vmul.f32 %v1033_v10, %v681_v12 }
 0x17f   :  { %v690_v18 = vmul.f32 %v679_v15, %v666_v14 }
 0x180   :  { %v683_v19 = vmul.f32 0.5, %v682_v16 }
 0x181   :  { %v694_v20 = vmul.f32 %v1028_v13, %v690_v18 }
 0x182   :  { %v684_v21 = vsub.f32 1.5, %v683_v19 }
 0x183   :  { %v698_v22 = vadd.f32 %v1029_v17, %v694_v20 }
 0x184   :  { %v685_v23 = vmul.f32 %v1033_v10, %v684_v21 }
 0x185   :  { %700 = vst [vmem:[%s1291_s4] sm:$0xff] %v698_v22 }
 0x186   :  { %v689_v25 = vsel %vm688_vm6, %v1033_v10, %v685_v23 }
 0x187   :  { %v691_v26 = vmul.f32 %v689_v25, %v667_v24 }
 0x189   :  { %v695_v27 = vmul.f32 %v1028_v13, %v691_v26 }
 0x18b   :  { %v699_v28 = vadd.f32 %v1029_v17, %v695_v27 }
 0x18d   :  { %701 = vst [vmem:[%s1291_s4 + $0x8] sm:$0xff] %v699_v28 }

</bundles_post_ra>
